<compile_context>
chip_gen: v5e
topology: v5e:2x2
jax: 0.10.0
libtpu: 0.0.40
codegen_flags: <defaults>
</compile_context>

<pallas_src>
from functools import partial

import jax
import jax.numpy as jnp
from jax.experimental import pallas as pl
from jax.experimental.pallas import tpu as pltpu


def _round_up(a, m):
    return (a + m - 1) // m * m


def _choose_tb(batch, input_size):
    """Pick the batch-tile (rows per grid step).

    Large tiles amortize the ~0.35 us per-step overhead; the cap is derived
    from a conservative VMEM budget so the double-buffered streams fit the
    smallest scoped-VMEM default across v5e / v6e / v7x.
    """
    # Streamed bytes per batch row per step: x (f32) + eps (bf16, 128 lanes)
    # + z (bf16, 128 lanes).  Pallas double-buffers each stream.
    bytes_per_row = 4 * input_size + 2 * 128 + 2 * 128
    budget = 8 << 20  # well under v5e's 16 MiB scoped default (v7x: 32 MiB)
    tb = min(1024, budget // (2 * bytes_per_row))
    tb = (tb // 128) * 128 if tb >= 128 else max(16, (tb // 16) * 16)
    if batch <= tb:
        if batch >= 256:
            # v7x megacore: at least 2 tiles so both TensorCores get work
            # (no effect on single-TC v5e / v6e).
            tb = min(batch, _round_up(pl.cdiv(batch, 2), 128))
        else:
            tb = batch  # single tile; block rows == full array dim is legal
    return tb


def encoder_kernel(x_ref, eps_ref, w1_ref, w2_ref, w3_ref, wh_ref, b_ref,
                   z_ref, kl_ref, *,
                   lay1, lay2, lay3, lay4, off2, off3, offh, batch, tb):
    f32, bf16 = jnp.float32, jnp.bfloat16

    # Packed biases: one [1, total] f32 row; every segment starts on a
    # 128-lane (vreg) boundary so these static slices need no lane shifts.
    b1 = b_ref[:, 0:lay1]
    b2 = b_ref[:, off2:off2 + lay2]
    b3 = b_ref[:, off3:off3 + lay3]
    bh = b_ref[:, offh:offh + 256]

    # Hidden MLP: f32 stream cast to bf16 in-register; MXU matmuls with f32
    # accumulation; bias add / ReLU / sigmoid / exp stay in f32 (v5e has no
    # bf16 VPU/EUP).
    x = x_ref[...].astype(bf16)                                       # [tb, in]
    h1 = jnp.maximum(jnp.dot(x, w1_ref[...], preferred_element_type=f32) + b1, 0.0)
    h2 = jnp.maximum(jnp.dot(h1.astype(bf16), w2_ref[...],
                             preferred_element_type=f32) + b2, 0.0)
    t3 = jnp.dot(h2.astype(bf16), w3_ref[...], preferred_element_type=f32) + b3
    # sigmoid = 1 / (1 + exp(-t)): exp and approx reciprocal both on the EUP.
    h3 = pl.reciprocal(1.0 + jnp.exp(-t3), approx=True)

    # Fused mean / log-var head: one MXU matmul, 128-aligned lane slices.
    head = jnp.dot(h3.astype(bf16), wh_ref[...], preferred_element_type=f32) + bh
    mu = head[:, :128]
    logvar = head[:, 128:]
    sigma = jnp.exp(logvar) + 1e-6

    # Reparameterisation; lane-dense unmasked bf16 store.  Lanes >= lay4 carry
    # junk (eps there is unused noise) and are sliced away by the host.
    z = mu + sigma * eps_ref[...].astype(f32)                         # [tb, 128]
    z_ref[...] = z.astype(bf16)

    # Per-tile KL partials: mask to the real lay4 lanes and to the in-batch
    # rows of the (possibly ragged) last tile, reduce over rows, and write the
    # per-lane partial sums into sublane 0 of this tile's (8, 128) slot.
    lane = jax.lax.broadcasted_iota(jnp.int32, (1, 128), 1)
    row = jax.lax.broadcasted_iota(jnp.int32, (tb, 1), 0)
    valid = (lane < lay4) & (row < (batch - pl.program_id(0) * tb))
    kl_elem = jnp.where(valid, sigma * sigma + mu * mu - logvar - 0.5, 0.0)
    kl_lane = jnp.sum(kl_elem, axis=0, keepdims=True)                 # [1, 128]
    sub = jax.lax.broadcasted_iota(jnp.int32, (8, 128), 0)
    kl_ref[...] = jnp.where(sub == 0, kl_lane, 0.0)


def encoder_forward(x, params, eps):
    """x: [B, ...] (flattened like torch.flatten(start_dim=1)).
    eps: N(0,1) noise, shape [B, 128] (lanes >= lay4 ignored) or [B, lay4].
    Returns (z [B, lay4] f32, kl scalar f32)."""
    (w1, b1, w2, b2, w3, b3, wm, bm, wv, bv) = params
    B = x.shape[0]
    x2d = x.reshape(B, -1)                 # metadata-only reshape, no cast/pad
    input_size = x2d.shape[1]
    lay1, lay2, lay3, lay4 = w1.shape[1], w2.shape[1], w3.shape[1], wm.shape[1]
    assert lay4 <= 128, "kernel packs z into a single 128-lane slab"

    # eps at the kernel's lane-padded bf16 layout (no copy when the caller
    # already provides [B, 128]).
    if eps.shape[1] == 128:
        eps_full = eps.astype(jnp.bfloat16)
    else:
        eps_full = jnp.zeros((B, 128), jnp.bfloat16).at[:, :eps.shape[1]].set(
            eps.astype(jnp.bfloat16))

    # bf16 MXU operands (f32 accumulation happens inside the kernel).
    w1b = w1.astype(jnp.bfloat16)
    w2b = w2.astype(jnp.bfloat16)
    w3b = w3.astype(jnp.bfloat16)

    # Fused + lane-padded head weight [lay3, 256]: mu columns at lanes
    # [0, lay4), log-var columns at lanes [128, 128+lay4); padding is zero.
    wh = jnp.zeros((lay3, 256), jnp.float32)
    wh = wh.at[:, :lay4].set(wm).at[:, 128:128 + lay4].set(wv)
    whb = wh.astype(jnp.bfloat16)

    # All biases packed into one [1, total] f32 row, 128-lane aligned segments.
    off2 = _round_up(lay1, 128)
    off3 = off2 + _round_up(lay2, 128)
    offh = off3 + _round_up(lay3, 128)
    total_b = offh + 256
    bias = jnp.zeros((1, total_b), jnp.float32)
    bias = (bias.at[:, :lay1].set(b1)
                .at[:, off2:off2 + lay2].set(b2)
                .at[:, off3:off3 + lay3].set(b3)
                .at[:, offh:offh + lay4].set(bm)
                .at[:, offh + 128:offh + 128 + lay4].set(bv))

    TB = _choose_tb(B, input_size)
    num_tiles = pl.cdiv(B, TB)             # ragged last tile handled in-kernel

    kernel = partial(encoder_kernel, lay1=lay1, lay2=lay2, lay3=lay3, lay4=lay4,
                     off2=off2, off3=off3, offh=offh, batch=B, tb=TB)

    grid_spec = pltpu.PrefetchScalarGridSpec(
        num_scalar_prefetch=0,
        grid=(num_tiles,),
        in_specs=[
            pl.BlockSpec((TB, input_size), lambda i: (i, 0)),    # x tile (f32)
            pl.BlockSpec((TB, 128), lambda i: (i, 0)),           # eps tile (bf16)
            pl.BlockSpec((input_size, lay1), lambda i: (0, 0)),  # weights stay
            pl.BlockSpec((lay1, lay2), lambda i: (0, 0)),        # resident
            pl.BlockSpec((lay2, lay3), lambda i: (0, 0)),        # across the
            pl.BlockSpec((lay3, 256), lambda i: (0, 0)),         # batch grid
            pl.BlockSpec((1, total_b), lambda i: (0, 0)),        # packed biases
        ],
        out_specs=[
            pl.BlockSpec((TB, 128), lambda i: (i, 0)),           # z slab (bf16)
            pl.BlockSpec((8, 128), lambda i: (i, 0)),            # per-tile KL
        ],
    )

    z_slab, kl_part = pl.pallas_call(
        kernel,
        out_shape=(jax.ShapeDtypeStruct((B, 128), jnp.bfloat16),
                   jax.ShapeDtypeStruct((num_tiles * 8, 128), jnp.float32)),
        grid_spec=grid_spec,
        # Independent batch tiles -> shard across v7x's 2 TensorCores; no-op
        # on single-TC v5e / v6e.
        compiler_params=pltpu.CompilerParams(dimension_semantics=("parallel",)),
    )(x2d, eps_full, w1b, w2b, w3b, whb, bias)

    z = z_slab[:, :lay4].astype(jnp.float32)
    kl = jnp.sum(kl_part)
    return z, kl


def init_params(key, input_size, lay1, lay2, lay3, lay4):
    """Deterministic init mirroring nn.Linear's U(-1/sqrt(fan_in), 1/sqrt(fan_in)).
    Weights are stored as [in, out] (transposed vs. PyTorch's [out, in])."""
    dims = [(input_size, lay1), (lay1, lay2), (lay2, lay3), (lay3, lay4), (lay3, lay4)]
    params = []
    for (fan_in, fan_out) in dims:
        key, kw, kb = jax.random.split(key, 3)
        bound = 1.0 / jnp.sqrt(fan_in)
        w = jax.random.uniform(kw, (fan_in, fan_out), jnp.float32, -bound, bound)
        b = jax.random.uniform(kb, (1, fan_out), jnp.float32, -bound, bound)
        params += [w, b]
    return tuple(params)


def reference_forward(x, params, eps):
    """Pure-JAX reference.  Matmuls mirror the kernel's bf16-operand /
    f32-accumulate path; sigmoid / z / KL are kept in plain f32, so the
    comparison tolerances cover the kernel's bf16 z store, approx reciprocal
    sigmoid, and raw-log-var KL shortcut."""
    (w1, b1, w2, b2, w3, b3, wm, bm, wv, bv) = params
    bf16 = jnp.bfloat16

    def lin(h, w, b):
        return jnp.dot(h.astype(bf16), w.astype(bf16),
                       preferred_element_type=jnp.float32) + b

    h = x.reshape(x.shape[0], -1).astype(jnp.float32)
    h = jnp.maximum(lin(h, w1, b1), 0.0)
    h = jnp.maximum(lin(h, w2, b2), 0.0)
    h = jax.nn.sigmoid(lin(h, w3, b3))
    mu = lin(h, wm, bm)
    sigma = jnp.exp(lin(h, wv, bv)) + 1e-6
    z = mu + sigma * eps
    kl = jnp.sum(sigma ** 2 + mu ** 2 - jnp.log(sigma) - 0.5)
    return z, kl


if __name__ == "__main__":
    # Small synthetic shapes consistent with the module: data is [N, 1, L],
    # input_size = data.shape[2].
    B, C, L = 2, 1, 32
    input_size = C * L
    lay1, lay2, lay3, lay4 = 32, 32, 32, 16

    root = jax.random.PRNGKey(0)
    k_x, k_p, k_eps = jax.random.split(root, 3)

    x = jax.random.normal(k_x, (B, C, L), jnp.float32)
    params = init_params(k_p, input_size, lay1, lay2, lay3, lay4)
    # Deterministic N(0,1) reparameterisation noise, generated directly at the
    # kernel's lane-padded bf16 layout (lanes >= lay4 are ignored) so no
    # host-side pad/cast pass is needed.
    eps = jax.random.normal(k_eps, (B, 128), jnp.bfloat16)

    z, kl = encoder_forward(x, params, eps)
    jax.block_until_ready((z, kl))

    z_ref, kl_ref = reference_forward(x, params, eps[:, :lay4].astype(jnp.float32))
    assert z.shape == (B, lay4)
    # Tolerances cover the intentional kernel deviations: bf16 z slab,
    # EUP-approx reciprocal in the sigmoid, raw-log-var KL term.
    assert jnp.allclose(z, z_ref, atol=3e-2, rtol=3e-2)
    assert jnp.allclose(kl, kl_ref, atol=2e-1, rtol=2e-2)

    print("KERNEL_OK")
</pallas_src>

<mosaic_0001>
module attributes {stable_mosaic.version = 11 : i64} {
  func.func @encoder_kernel(%arg0: i32, %arg1: memref<2x32xf32, #tpu.memory_space<vmem>>, %arg2: memref<2x128xbf16, #tpu.memory_space<vmem>>, %arg3: memref<32x32xbf16, #tpu.memory_space<vmem>>, %arg4: memref<32x32xbf16, #tpu.memory_space<vmem>>, %arg5: memref<32x32xbf16, #tpu.memory_space<vmem>>, %arg6: memref<32x256xbf16, #tpu.memory_space<vmem>>, %arg7: memref<1x640xf32, #tpu.memory_space<vmem>>, %arg8: memref<2x128xbf16, #tpu.memory_space<vmem>>, %arg9: memref<8x128xf32, #tpu.memory_space<vmem>>) attributes {dimension_semantics = [#tpu.dimension_semantics<parallel>], iteration_bounds = array<i64: 1>, scalar_prefetch = 0 : i64, scratch_operands = 0 : i64, tpu.core_type = #tpu.core_type<tc>, window_params = [{transform_indices = @transform_0, window_bounds = array<i64: 2, 32>}, {transform_indices = @transform_1, window_bounds = array<i64: 2, 128>}, {pipeline_mode = #tpu.pipeline_mode<synchronous>, transform_indices = @transform_2, window_bounds = array<i64: 32, 32>}, {pipeline_mode = #tpu.pipeline_mode<synchronous>, transform_indices = @transform_3, window_bounds = array<i64: 32, 32>}, {pipeline_mode = #tpu.pipeline_mode<synchronous>, transform_indices = @transform_4, window_bounds = array<i64: 32, 32>}, {pipeline_mode = #tpu.pipeline_mode<synchronous>, transform_indices = @transform_5, window_bounds = array<i64: 32, 256>}, {pipeline_mode = #tpu.pipeline_mode<synchronous>, transform_indices = @transform_6, window_bounds = array<i64: 1, 640>}, {transform_indices = @transform_7, window_bounds = array<i64: 2, 128>}, {transform_indices = @transform_8, window_bounds = array<i64: 8, 128>}]} {
    %c0 = arith.constant 0 : index
    %c0_0 = arith.constant 0 : index
    %0 = vector.load %arg7[%c0, %c0_0] : memref<1x640xf32, #tpu.memory_space<vmem>>, vector<1x32xf32>
    %c0_1 = arith.constant 0 : index
    %c128 = arith.constant 128 : index
    %1 = vector.load %arg7[%c0_1, %c128] : memref<1x640xf32, #tpu.memory_space<vmem>>, vector<1x32xf32>
    %c0_2 = arith.constant 0 : index
    %c256 = arith.constant 256 : index
    %2 = vector.load %arg7[%c0_2, %c256] : memref<1x640xf32, #tpu.memory_space<vmem>>, vector<1x32xf32>
    %c0_3 = arith.constant 0 : index
    %c384 = arith.constant 384 : index
    %3 = vector.load %arg7[%c0_3, %c384] : memref<1x640xf32, #tpu.memory_space<vmem>>, vector<1x256xf32>
    %c0_4 = arith.constant 0 : index
    %c0_5 = arith.constant 0 : index
    %4 = vector.load %arg1[%c0_4, %c0_5] : memref<2x32xf32, #tpu.memory_space<vmem>>, vector<2x32xf32>
    %5 = arith.truncf %4 : vector<2x32xf32> to vector<2x32xbf16>
    %c0_6 = arith.constant 0 : index
    %c0_7 = arith.constant 0 : index
    %6 = vector.load %arg3[%c0_6, %c0_7] : memref<32x32xbf16, #tpu.memory_space<vmem>>, vector<32x32xbf16>
    %cst = arith.constant dense<0.000000e+00> : vector<2x32xf32>
    %7 = tpu.matmul %5, %6, %cst {dimension_numbers = #tpu.dot_dimension_numbers<[1], [0], [0], [1], [0, 0, 1, 1], [], []>} : vector<2x32xbf16>, vector<32x32xbf16>, vector<2x32xf32> -> vector<2x32xf32>
    %8 = vector.broadcast %0 : vector<1x32xf32> to vector<2x32xf32>
    %9 = arith.addf %7, %8 : vector<2x32xf32>
    %cst_8 = arith.constant 0.000000e+00 : f32
    %10 = vector.broadcast %cst_8 : f32 to vector<2x32xf32>
    %11 = arith.maximumf %9, %10 : vector<2x32xf32>
    %12 = arith.truncf %11 : vector<2x32xf32> to vector<2x32xbf16>
    %c0_9 = arith.constant 0 : index
    %c0_10 = arith.constant 0 : index
    %13 = vector.load %arg4[%c0_9, %c0_10] : memref<32x32xbf16, #tpu.memory_space<vmem>>, vector<32x32xbf16>
    %cst_11 = arith.constant dense<0.000000e+00> : vector<2x32xf32>
    %14 = tpu.matmul %12, %13, %cst_11 {dimension_numbers = #tpu.dot_dimension_numbers<[1], [0], [0], [1], [0, 0, 1, 1], [], []>} : vector<2x32xbf16>, vector<32x32xbf16>, vector<2x32xf32> -> vector<2x32xf32>
    %15 = vector.broadcast %1 : vector<1x32xf32> to vector<2x32xf32>
    %16 = arith.addf %14, %15 : vector<2x32xf32>
    %cst_12 = arith.constant 0.000000e+00 : f32
    %17 = vector.broadcast %cst_12 : f32 to vector<2x32xf32>
    %18 = arith.maximumf %16, %17 : vector<2x32xf32>
    %19 = arith.truncf %18 : vector<2x32xf32> to vector<2x32xbf16>
    %c0_13 = arith.constant 0 : index
    %c0_14 = arith.constant 0 : index
    %20 = vector.load %arg5[%c0_13, %c0_14] : memref<32x32xbf16, #tpu.memory_space<vmem>>, vector<32x32xbf16>
    %cst_15 = arith.constant dense<0.000000e+00> : vector<2x32xf32>
    %21 = tpu.matmul %19, %20, %cst_15 {dimension_numbers = #tpu.dot_dimension_numbers<[1], [0], [0], [1], [0, 0, 1, 1], [], []>} : vector<2x32xbf16>, vector<32x32xbf16>, vector<2x32xf32> -> vector<2x32xf32>
    %22 = vector.broadcast %2 : vector<1x32xf32> to vector<2x32xf32>
    %23 = arith.addf %21, %22 : vector<2x32xf32>
    %cst_16 = arith.constant 0.000000e+00 : f32
    %24 = vector.broadcast %cst_16 : f32 to vector<2x32xf32>
    %25 = arith.subf %24, %23 : vector<2x32xf32>
    %26 = math.exp %25 : vector<2x32xf32>
    %cst_17 = arith.constant 1.000000e+00 : f32
    %27 = vector.broadcast %cst_17 : f32 to vector<2x32xf32>
    %28 = arith.addf %27, %26 : vector<2x32xf32>
    %29 = tpu.reciprocal %28 {approx = true} : vector<2x32xf32> -> vector<2x32xf32>
    %30 = arith.truncf %29 : vector<2x32xf32> to vector<2x32xbf16>
    %c0_18 = arith.constant 0 : index
    %c0_19 = arith.constant 0 : index
    %31 = vector.load %arg6[%c0_18, %c0_19] : memref<32x256xbf16, #tpu.memory_space<vmem>>, vector<32x256xbf16>
    %cst_20 = arith.constant dense<0.000000e+00> : vector<2x256xf32>
    %32 = tpu.matmul %30, %31, %cst_20 {dimension_numbers = #tpu.dot_dimension_numbers<[1], [0], [0], [1], [0, 0, 1, 1], [], []>} : vector<2x32xbf16>, vector<32x256xbf16>, vector<2x256xf32> -> vector<2x256xf32>
    %33 = vector.broadcast %3 : vector<1x256xf32> to vector<2x256xf32>
    %34 = arith.addf %32, %33 : vector<2x256xf32>
    %35 = vector.extract_strided_slice %34 {offsets = [0, 0], sizes = [2, 128], strides = [1, 1]} : vector<2x256xf32> to vector<2x128xf32>
    %36 = vector.extract_strided_slice %34 {offsets = [0, 128], sizes = [2, 128], strides = [1, 1]} : vector<2x256xf32> to vector<2x128xf32>
    %37 = math.exp %36 : vector<2x128xf32>
    %cst_21 = arith.constant 9.99999997E-7 : f32
    %38 = vector.broadcast %cst_21 : f32 to vector<2x128xf32>
    %39 = arith.addf %37, %38 : vector<2x128xf32>
    %c0_22 = arith.constant 0 : index
    %c0_23 = arith.constant 0 : index
    %40 = vector.load %arg2[%c0_22, %c0_23] : memref<2x128xbf16, #tpu.memory_space<vmem>>, vector<2x128xbf16>
    %41 = arith.extf %40 : vector<2x128xbf16> to vector<2x128xf32>
    %42 = arith.mulf %39, %41 : vector<2x128xf32>
    %43 = arith.addf %35, %42 : vector<2x128xf32>
    %44 = arith.truncf %43 : vector<2x128xf32> to vector<2x128xbf16>
    %c0_24 = arith.constant 0 : index
    %c0_25 = arith.constant 0 : index
    %45 = vector.load %arg8[%c0_24, %c0_25] : memref<2x128xbf16, #tpu.memory_space<vmem>>, vector<2x128xbf16>
    tpu.vector_store %arg8[%c0_24, %c0_25], %44 {strides = array<i32>} : memref<2x128xbf16, #tpu.memory_space<vmem>>, vector<2x128xbf16>,
    %46 = tpu.iota {dimensions = array<i32: 1>} : vector<1x128xi32>
    %47 = tpu.iota {dimensions = array<i32: 0>} : vector<2x1xi32>
    %c16_i32 = arith.constant 16 : i32
    %48 = vector.broadcast %c16_i32 : i32 to vector<1x128xi32>
    %49 = arith.cmpi slt, %46, %48 : vector<1x128xi32>
    %c2_i32 = arith.constant 2 : i32
    %50 = arith.muli %arg0, %c2_i32 : i32
    %c2_i32_26 = arith.constant 2 : i32
    %51 = arith.subi %c2_i32_26, %50 : i32
    %52 = vector.broadcast %51 : i32 to vector<2x1xi32>
    %53 = arith.cmpi slt, %47, %52 : vector<2x1xi32>
    %54 = vector.broadcast %49 : vector<1x128xi1> to vector<2x128xi1>
    %55 = vector.broadcast %53 : vector<2x1xi1> to vector<2x128xi1>
    %56 = arith.andi %54, %55 : vector<2x128xi1>
    %57 = arith.mulf %39, %39 : vector<2x128xf32>
    %58 = arith.mulf %35, %35 : vector<2x128xf32>
    %59 = arith.addf %57, %58 : vector<2x128xf32>
    %60 = arith.subf %59, %36 : vector<2x128xf32>
    %cst_27 = arith.constant 5.000000e-01 : f32
    %61 = vector.broadcast %cst_27 : f32 to vector<2x128xf32>
    %62 = arith.subf %60, %61 : vector<2x128xf32>
    %cst_28 = arith.constant 0.000000e+00 : f32
    %63 = vector.broadcast %cst_28 : f32 to vector<2x128xf32>
    %64 = arith.select %56, %62, %63 : vector<2x128xi1>, vector<2x128xf32>
    %cst_29 = arith.constant dense<0.000000e+00> : vector<128xf32>
    %65 = vector.multi_reduction <add>, %64, %cst_29 [0] : vector<2x128xf32> to vector<128xf32>
    %66 = vector.shape_cast %65 : vector<128xf32> to vector<1x128xf32>
    %67 = tpu.iota {dimensions = array<i32: 0>} : vector<8x128xi32>
    %c0_i32 = arith.constant 0 : i32
    %68 = vector.broadcast %c0_i32 : i32 to vector<8x128xi32>
    %69 = arith.cmpi eq, %67, %68 : vector<8x128xi32>
    %cst_30 = arith.constant 0.000000e+00 : f32
    %70 = vector.shape_cast %66 : vector<1x128xf32> to vector<1x128xf32>
    %71 = vector.broadcast %70 : vector<1x128xf32> to vector<8x128xf32>
    %72 = vector.broadcast %cst_30 : f32 to vector<8x128xf32>
    %73 = arith.select %69, %71, %72 : vector<8x128xi1>, vector<8x128xf32>
    %c0_31 = arith.constant 0 : index
    %c0_32 = arith.constant 0 : index
    %74 = vector.load %arg9[%c0_31, %c0_32] : memref<8x128xf32, #tpu.memory_space<vmem>>, vector<8x128xf32>
    tpu.vector_store %arg9[%c0_31, %c0_32], %73 {strides = array<i32>} : memref<8x128xf32, #tpu.memory_space<vmem>>, vector<8x128xf32>,
    return
  }
  func.func @transform_0(%arg0: i32) -> (i32, i32) {
    %c0_i32 = arith.constant 0 : i32
    %c0_i32_0 = arith.constant 0 : i32
    return %arg0, %c0_i32 : i32, i32
  }
  func.func @transform_1(%arg0: i32) -> (i32, i32) {
    %c0_i32 = arith.constant 0 : i32
    %c0_i32_0 = arith.constant 0 : i32
    return %arg0, %c0_i32 : i32, i32
  }
  func.func @transform_2(%arg0: i32) -> (i32, i32) {
    %c0_i32 = arith.constant 0 : i32
    %c0_i32_0 = arith.constant 0 : i32
    %c0_i32_1 = arith.constant 0 : i32
    return %c0_i32, %c0_i32_0 : i32, i32
  }
  func.func @transform_3(%arg0: i32) -> (i32, i32) {
    %c0_i32 = arith.constant 0 : i32
    %c0_i32_0 = arith.constant 0 : i32
    %c0_i32_1 = arith.constant 0 : i32
    return %c0_i32, %c0_i32_0 : i32, i32
  }
  func.func @transform_4(%arg0: i32) -> (i32, i32) {
    %c0_i32 = arith.constant 0 : i32
    %c0_i32_0 = arith.constant 0 : i32
    %c0_i32_1 = arith.constant 0 : i32
    return %c0_i32, %c0_i32_0 : i32, i32
  }
  func.func @transform_5(%arg0: i32) -> (i32, i32) {
    %c0_i32 = arith.constant 0 : i32
    %c0_i32_0 = arith.constant 0 : i32
    %c0_i32_1 = arith.constant 0 : i32
    return %c0_i32, %c0_i32_0 : i32, i32
  }
  func.func @transform_6(%arg0: i32) -> (i32, i32) {
    %c0_i32 = arith.constant 0 : i32
    %c0_i32_0 = arith.constant 0 : i32
    %c0_i32_1 = arith.constant 0 : i32
    return %c0_i32, %c0_i32_0 : i32, i32
  }
  func.func @transform_7(%arg0: i32) -> (i32, i32) {
    %c0_i32 = arith.constant 0 : i32
    %c0_i32_0 = arith.constant 0 : i32
    return %arg0, %c0_i32 : i32, i32
  }
  func.func @transform_8(%arg0: i32) -> (i32, i32) {
    %c0_i32 = arith.constant 0 : i32
    %c0_i32_0 = arith.constant 0 : i32
    return %arg0, %c0_i32 : i32, i32
  }
}

</mosaic_0001>

<bundles_post_ra>
// kernel: tpu_custom_call.1
= control target key start
LH: loop header
LB: loop body
LE: loop exit
PB: predicated region body
PF: predicated region fallthrough
CT: control target
= control target key end

     0   :  { %14 = vsyncpa [#allocation3], 0  ;;  %s756_s0 = inlined_call_operand.hbm [shape: f32[2,32], index: 0, kind: input, shape index: {}]   ;;  %s757_s1 = inlined_call_operand.hbm [shape: bf16[2,128], index: 1, kind: input, shape index: {}]   ;;  %s758_s2 = inlined_call_operand.hbm [shape: bf16[32,32], index: 2, kind: input, shape index: {}]   ;;  %s759_s3 = inlined_call_operand.hbm [shape: bf16[32,32], index: 3, kind: input, shape index: {}]   ;;  %s760_s4 = inlined_call_operand.hbm [shape: bf16[32,32], index: 4, kind: input, shape index: {}]   ;;  %s761_s5 = inlined_call_operand.hbm [shape: bf16[32,256], index: 5, kind: input, shape index: {}]   ;;  %s762_s6 = inlined_call_operand.vmem [shape: f32[1,640], index: 6, kind: input, shape index: {}]   ;;  %s763_s7 = inlined_call_operand.hbm [shape: bf16[2,128], index: 7, kind: output, shape index: {0}]   ;;  %s764_s8 = inlined_call_operand.hbm [shape: f32[8,128], index: 8, kind: output, shape index: {1}]  }
   0x1   :  { %15 = vsyncpa [#allocation6], 0 }
   0x2   :  { %16 = vsyncpa [#allocation9], 0 }
   0x3   :  { %17 = vsyncpa [#allocation12], 0 }
   0x4   :  { %18 = vsyncpa [#allocation4], 0  ;;  %s36_s29 = sshll.u32 %s757_s1, 4  ;;  %s37_s29 = int_to_ptr.hbm [resolvable:$true] %s36_s29 }
   0x5   :  { %19 = vsyncpa [#allocation15], 0  ;;  %s658_s30 = smov [#allocation5]   ;;  %s59_s12 = sshll.u32 %s759_s3, 4  ;;  %s60_s12 = int_to_ptr.hbm [resolvable:$true] %s59_s12 }
   0x6   :  { %s38_s9 = sshll.u32 %s658_s30, 4  ;;  %s659_s13 = smov [#allocation8]   ;;  %s39_s9 = int_to_ptr.vmem [resolvable:$true] %s38_s9 }
   0x7   :  { %41 = dma.hbm_to_vmem [thread:$0]  %s37_s29, 16, %s39_s9, [#allocation6]  }
   0x8   :  { %s61_s14 = sshll.u32 %s659_s13, 4  ;;  %s25_s17 = sshll.u32 %s756_s0, 4  ;;  %s62_s14 = int_to_ptr.vmem [resolvable:$true] %s61_s14  ;;  %s26_s17 = int_to_ptr.hbm [resolvable:$true] %s25_s17 }
   0x9   :  { %s660_s1 = smov 64   ;;  %s661_s18 = smov 4  }
   0xa   :  { %67 = dma.hbm_to_vmem [thread:$0]  %s60_s12, 256, %s62_s14, [#allocation9], %s660_s1, %s660_s1, %s661_s18  }
   0xb   :  { %s46_s21 = sshll.u32 %s758_s2, 4  ;;  %s662_s22 = smov [#allocation2]   ;;  %s47_s21 = int_to_ptr.hbm [resolvable:$true] %s46_s21 }
   0xc   :  { %s27_s23 = sshll.u32 %s662_s22, 4  ;;  %s663_s3 = smov [#allocation7]   ;;  %s28_s23 = int_to_ptr.vmem [resolvable:$true] %s27_s23 }
   0xd   :  { %30 = dma.hbm_to_vmem [thread:$0]  %s26_s17, 32, %s28_s23, [#allocation3]  }
   0xe   :  { %s48_s24 = sshll.u32 %s663_s3, 4  ;;  %s72_s0 = sshll.u32 %s760_s4, 4  ;;  %s49_s24 = int_to_ptr.vmem [resolvable:$true] %s48_s24  ;;  %s73_s0 = int_to_ptr.hbm [resolvable:$true] %s72_s0 }
   0xf   :  { %54 = dma.hbm_to_vmem [thread:$0]  %s47_s21, 256, %s49_s24, [#allocation6], %s660_s1, %s660_s1, %s661_s18  }
  0x10   :  { %s85_s29 = sshll.u32 %s761_s5, 4  ;;  %s664_s30 = smov [#allocation10]   ;;  %s86_s29 = int_to_ptr.hbm [resolvable:$true] %s85_s29 }
  0x11   :  { %s74_s2 = sshll.u32 %s664_s30, 4  ;;  %s665_s9 = smov [#allocation11]   ;;  %s75_s2 = int_to_ptr.vmem [resolvable:$true] %s74_s2 }
  0x12   :  { %80 = dma.hbm_to_vmem [thread:$0]  %s73_s0, 256, %s75_s2, [#allocation9], %s660_s1, %s660_s1, %s661_s18  }
  0x13   :  { %s87_s10 = sshll.u32 %s665_s9, 4  ;;  %s666_s11 = smov 128   ;;  %s88_s10 = int_to_ptr.vmem [resolvable:$true] %s87_s10 }
  0x14   :  { %s667_s12 = smov 8  }
  0x15   :  { %93 = dma.hbm_to_vmem [thread:$0]  %s86_s29, 512, %s88_s10, [#allocation12], %s666_s11, %s666_s11, %s667_s12  }
  0x16   :  { %646 = dma.done.wait [#allocation3], 32  }
  0x17   :  { %647 = vsyncadd [#allocation3], 4294967264 }
  0x18   :  { %648 = dma.done.wait [#allocation6], 272  }
  0x19   :  { %649 = vsyncadd [#allocation6], 4294967024 }
  0x1a   :  { %650 = dma.done.wait [#allocation9], 512  }
  0x1b   :  { %651 = vsyncadd [#allocation9], 4294966784 }
  0x1c   :  { %652 = dma.done.wait [#allocation12], 512  }
  0x1d   :  { %653 = vsyncadd [#allocation12], 4294966784  ;;  %v424_v0 = vld [vmem:[#allocation7 + $0x8] sm:$0xff]  ;;  %v423_v1 = vld [vmem:[#allocation7] sm:$0xff]  ;;  %vm146_vm0 = vcmask 261120   ;;  %v310_v51 = vlaneseq  ;;  %s348_s21 = sshll.u32 %s763_s7, 4  ;;  %s349_s21 = int_to_ptr.hbm [resolvable:$true] %s348_s21 }
  0x1e   :  { %156 = vmatpush.bf16.msra.mxu0 %v424_v0  ;;  %v125_v2 = vld [vmem:[#allocation2] sm:$0x3]  ;;  %v425_v5 = vld [vmem:[#allocation8] sm:$0xff]  ;;  %v428_v12 = vld [vmem:[#allocation10 + $0x8] sm:$0xff]  ;;  %vm330_vm4 = vcmask 1041408   ;;  %s669_s7 = smov [#allocation14]  }
  0x1f   :  { %v126_v3 = vpack.c.bf16 %v125_v2, %v125_v2  ;;  %v426_v4 = vld [vmem:[#allocation8 + $0x8] sm:$0xff]  ;;  %230 = vmatpush.bf16.msra.mxu2 %v428_v12  ;;  %v427_v13 = vld [vmem:[#allocation10] sm:$0xff]  ;;  %v416_v21 = vld [vmem:[#allocation11 + $0x18] sm:$0xf0]  ;;  %v311_v56 = vand.u32 127, %v310_v51  ;;  %v313_v57 = vshrl.u32 %v310_v51, 7 }
  0x20   :  { %193 = vmatpush.bf16.msra.mxu1 %v426_v4  ;;  %v445_v6 = vld [vmem:[%s762_s6] ss:$0 sm:$0xff]  ;;  %v446_v14 = vld [vmem:[%s762_s6 + $0x1] ss:$0 sm:$0xff]  ;;  %v431_v20 = vld [vmem:[#allocation11 + $0x14] sm:$0xf] }
  0x21   :  { %v414_v22 = vld [vmem:[#allocation11 + $0x10] sm:$0xf]  ;;  %v419_v23 = vor.u32 %v431_v20, %v416_v21  ;;  %v429_v24 = vld [vmem:[#allocation11 + $0x4] sm:$0xf]  ;;  %v408_v25 = vld [vmem:[#allocation11 + $0x8] sm:$0xf0] }
  0x22   :  { %157 = vmatpush.bf16.msra.mxu0 %v423_v1  ;;  %v432_v26 = vld [vmem:[#allocation11 + $0x14] sm:$0xf0]  ;;  %v406_v28 = vld [vmem:[#allocation11] sm:$0xf]  ;;  %v430_v29 = vld [vmem:[#allocation11 + $0x4] sm:$0xf0]  ;;  %v411_v30 = vor.u32 %v429_v24, %v408_v25 }
  0x23   :  { %231 = vmatpush.bf16.msra.mxu2 %v427_v13  ;;  %v415_v27 = vor.u32 %v432_v26, %v414_v22  ;;  %v407_v31 = vor.u32 %v430_v29, %v406_v28  ;;  %v447_v32 = vld [vmem:[%s762_s6 + $0x2] ss:$0 sm:$0xff]  ;;  %v124_v42 = vld [vmem:[%s762_s6 + $0x3] sm:$0x3]  ;;  %s668_s6 = smov [#allocation13]   ;;  %vm314_vm1 = vcmp.lt.s32.totalorder %v311_v56, 16 }
  0x24   :  { %194 = vmatpush.bf16.msra.mxu1 %v425_v5  ;;  %v249_v43 = vperm.slane %v124_v42, 1  ;;  %v248_v47 = vperm.slane %v124_v42, 0  ;;  %v304_v49 = vld [vmem:[#allocation5] sm:$0x1]  ;;  %s346_s18 = sshll.u32 %s668_s6, 4  ;;  %vm318_vm2 = vcmp.lt.s32.totalorder %v313_v57, 2  ;;  %s347_s18 = int_to_ptr.vmem [resolvable:$true] %s346_s18 }
  0x25   :  { %385 = vmatmul.msk.bf16.vlgmr.msra.gmra.mxu0 %vm146_vm0, %v126_v3  ;;  %281 = vmatpush.bf16.msra.mxu3 %v415_v27  ;;  %v305_v53 = vunpack.c.l.bf16 %v304_v49  ;;  %vm323_vm3 = vmand %vm314_vm1, %vm318_vm2  ;;  %s357_s22 = sshll.u32 %s669_s7, 4  ;;  %s359_s24 = sshll.u32 %s764_s8, 4  ;;  %vm338_vm5 = vcmp.eq.s32.totalorder %v313_v57, 0  ;;  %s358_s22 = int_to_ptr.vmem [resolvable:$true] %s357_s22  ;;  %s360_s24 = int_to_ptr.hbm [resolvable:$true] %s359_s24 }
  0x26   :  { %294 = vmatpush.bf16.msrb.mxu0 %v419_v23 }
  0x29   :  { %282 = vmatpush.bf16.msra.mxu3 %v407_v31 }
  0x2a   :  { %295 = vmatpush.bf16.msrb.mxu0 %v411_v30 }
  0xa2   :  { %v159_v7 = vpop.f32.mrf.mxu0 }
  0xa3   :  { %v160_v8 = vadd.f32 %v445_v6, %v159_v7 }
  0xa5   :  { %v163_v9 = vmax.f32 %v160_v8, 0.0 }
  0xa7   :  { %v164_v10 = vpack.c.bf16 %v163_v9, %v163_v9 }
  0xa9   :  { %394 = vmatmul.msk.bf16.vlgmr.msra.gmra.mxu1 %vm146_vm0, %v164_v10 }
  0xaa   :  { %v161_v11 = vpop.f32.mrf.mxu0 }
 0x126   :  { %v196_v15 = vpop.f32.mrf.mxu1 }
 0x127   :  { %v197_v16 = vadd.f32 %v446_v14, %v196_v15 }
 0x129   :  { %v200_v17 = vmax.f32 %v197_v16, 0.0 }
 0x12b   :  { %v201_v18 = vpack.c.bf16 %v200_v17, %v200_v17 }
 0x12d   :  { %403 = vmatmul.msk.bf16.vlgmr.msra.gmra.mxu2 %vm146_vm0, %v201_v18 }
 0x12e   :  { %v198_v19 = vpop.f32.mrf.mxu1 }
 0x1b0   :  { %v233_v33 = vpop.f32.mrf.mxu2 }
 0x1b1   :  { %v234_v34 = vadd.f32 %v447_v32, %v233_v33 }
 0x1b3   :  { %v237_v35 = vsub.f32 0.0, %v234_v34 }
 0x1b5   :  { %v238_v36 = vmul.f32 1.442695, %v237_v35 }
 0x1b7   :  { %448 = vpow2.f32 %v238_v36 }
 0x1b8   :  { %v235_v37 = vpop.f32.mrf.mxu2 }
 0x1bd   :  { %v449_v38 = vpop.eup %448 }
 0x1be   :  { %v240_v39 = vadd.f32 1.0, %v449_v38 }
 0x1c0   :  { %450 = vrcp.f32 %v240_v39 }
 0x1c6   :  { %v451_v40 = vpop.eup %450 }
 0x1c7   :  { %v242_v41 = vpack.c.bf16 %v451_v40, %v451_v40 }
 0x1c9   :  { %420 = vmatmul.msk.bf16.vlgmr.msra.gmra.mxu3 %vm146_vm0, %v242_v41  ;;  %421 = vmatmul.msk.bf16.vlgmr.msrb.gmra.mxu0 %vm146_vm0, %v242_v41 }
 0x246   :  { %v297_v44 = vpop.f32.mrf.mxu0 }
 0x247   :  { %v298_v45 = vadd.f32 %v297_v44, %v249_v43 }
 0x249   :  { %v301_v46 = vmul.f32 1.442695, %v298_v45 }
 0x24b   :  { %452 = vpow2.f32 %v301_v46 }
 0x24c   :  { %v284_v48 = vpop.f32.mrf.mxu3 }
 0x24d   :  { %v285_v52 = vadd.f32 %v284_v48, %v248_v47 }
 0x24e   :  { %v299_v50 = vpop.f32.mrf.mxu0 }
 0x24f   :  { %v325_v60 = vmul.f32 %v285_v52, %v285_v52 }
 0x251   :  { %v453_v54 = vpop.eup %452 }
 0x252   :  { %v303_v55 = vadd.f32 1e-06, %v453_v54 }
 0x254   :  { %v306_v58 = vmul.f32 %v305_v53, %v303_v55  ;;  %v324_v59 = vmul.f32 %v303_v55, %v303_v55  ;;  %v286_v61 = vpop.f32.mrf.mxu3 }
 0x256   :  { %v307_v62 = vadd.f32 %v306_v58, %v285_v52  ;;  %v326_v63 = vadd.f32 %v325_v60, %v324_v59 }
 0x258   :  { %v308_v0 = vpack.c.bf16 %v307_v62, %v307_v62  ;;  %v327_v1 = vsub.f32 %v326_v63, %v298_v45 }
 0x25a   :  { %v422_v2 = vadd.f32 -0.5, %v327_v1  ;;  %309 = vst [vmem:[#allocation13] sm:$0x1] %v308_v0 }
 0x25b   :  { %351 = dma.vmem_to_hbm [thread:$0]  %s347_s18, 16, %s349_s21, [#allocation4]  }
 0x25c   :  { %v329_v3 = vsel %vm323_vm3, %v422_v2, 0.0 }
 0x25d   :  { %v331_v4 = vsel %vm330_vm4, %v329_v3, 0.0 }
 0x25e   :  { %v332_v5 = vrot.slane %v331_v4, 4 }
 0x260   :  { %v333_v6 = vadd.f32 %v332_v5, %v331_v4 }
 0x262   :  { %v334_v7 = vrot.slane %v333_v6, 2 }
 0x264   :  { %v335_v8 = vadd.f32 %v334_v7, %v333_v6 }
 0x266   :  { %v336_v9 = vrot.slane %v335_v8, 1 }
 0x268   :  { %v337_v10 = vadd.f32 %v336_v9, %v335_v8 }
 0x26a   :  { %v339_v11 = vsel %vm338_vm5, %v337_v10, 0.0 }
 0x26b   :  { %340 = vst [vmem:[#allocation14] sm:$0xff] %v339_v11 }
 0x26c   :  { %362 = dma.vmem_to_hbm [thread:$0]  %s358_s22, 128, %s360_s24, [#allocation15]  }
 0x26d   :  { %654 = dma.done.wait [#allocation4], 16  }
 0x26e   :  { %655 = vsyncadd [#allocation4], 4294967280 }
 0x26f   :  { %656 = dma.done.wait [#allocation15], 128  }
 0x270   :  { %657 = vsyncadd [#allocation15], 4294967168 }
 0x271   :  { %371 = vsyncpa [#allocation3], 1 }
 0x272   :  { %372 = vsyncpa [#allocation6], 1 }
 0x273   :  { %373 = vsyncpa [#allocation9], 1 }
 0x274   :  { %374 = vsyncpa [#allocation12], 1 }
 0x275   :  { %375 = vsyncpa [#allocation4], 1 }
 0x276   :  { %376 = vsyncpa [#allocation15], 1 }

</bundles_post_ra>
